<compile_context>
chip_gen: v7x
topology: tpu7x:2x2x1
jax: 0.10.0
libtpu: 0.0.40
codegen_flags: <defaults>
</compile_context>

<pallas_src>
import functools

import jax
import jax.numpy as jnp
from jax.experimental import pallas as pl
from jax.experimental.pallas import tpu as pltpu


def _round_up(n, m):
    return (n + m - 1) // m * m


# --------------------------------------------------------------------------
# Single pass: activations, both linears, raw mu / logvar, BN partial stats.
# --------------------------------------------------------------------------
def _encoder_kernel(x_ref,
                    w1lv_ref, b1lv_ref,
                    w2lv_ref, b2lv_ref,
                    w1mu_ref, b1mu_ref,
                    mu_ref, logvar_ref, sum_ref, sq_ref,
                    *, tile_m, m_valid, latent):
    i = pl.program_id(0)

    x = x_ref[...].astype(jnp.float32)

    # xl = log(softplus(x)); branchless, numerically stable form:
    #   softplus(x) = max(x, 0) + log1p(exp(-|x|))
    # (matches PyTorch behavior; underflows to -inf only for x << -88, like the
    #  reference).
    sp = jnp.maximum(x, 0.0) + jnp.log1p(jnp.exp(-jnp.abs(x)))
    xl = jnp.log(sp)
    xl_bf = xl.astype(jnp.bfloat16)               # bf16 MXU operands

    # h = relu(fc1_logvar(xl))        (padded to HP lanes; pad cols are zero)
    h = jnp.dot(xl_bf, w1lv_ref[...], preferred_element_type=jnp.float32)
    h = jnp.maximum(h + b1lv_ref[...], 0.0)

    # logvar = fc2_logvar(h)
    logvar = jnp.dot(h.astype(jnp.bfloat16), w2lv_ref[...],
                     preferred_element_type=jnp.float32) + b2lv_ref[...]

    # mu = fc1_mu(xl)
    mu = jnp.dot(xl_bf, w1mu_ref[...],
                 preferred_element_type=jnp.float32) + b1mu_ref[...]

    # Store only the valid latent columns to HBM (compute stays lane-dense).
    mu_ref[...] = mu[:, :latent]
    logvar_ref[...] = logvar[:, :latent]

    # Per-tile BatchNorm partial statistics over *valid* rows only (rows padded
    # beyond m_valid must not pollute the mean/variance).  Reduce sublane
    # groups-of-8 only (cheap cross-tile VALU adds); the final 8 -> 1 and
    # per-tile reductions happen in the tiny JAX finalize.
    row = i * tile_m + jax.lax.broadcasted_iota(jnp.int32, (tile_m, 1), 0)
    valid = (row < m_valid).astype(jnp.float32)
    mu_m = mu * valid
    groups = tile_m // 8
    lp = mu.shape[1]
    sum_ref[...] = jnp.sum(mu_m.reshape(groups, 8, lp), axis=0)
    sq_ref[...] = jnp.sum((mu_m * mu).reshape(groups, 8, lp), axis=0)


def encoder_forward(x, params, *, tile_m=4096, eps=1e-5):
    """x: (B, S, input_dim) float32. Returns (mu, logvar), each (B, S, latent)."""
    w1lv, b1lv, w2lv, b2lv, w1mu, b1mu, gamma, beta = params
    B, S, D = x.shape
    H = w1lv.shape[1]
    L = w1mu.shape[1]
    M = B * S

    # Lane-dense / MXU-friendly padded feature dims for the in-VMEM compute.
    HP = _round_up(H, 128)
    LP = _round_up(L, 128)

    # Row tile: multiple of 8 sublanes; big tiles amortize per-step overhead.
    tile_m = _round_up(tile_m, 8)
    tm = min(tile_m, _round_up(M, 8))
    MP = _round_up(M, tm)
    grid_m = MP // tm

    xf = x.reshape(M, D)
    if MP != M:
        xf = jnp.pad(xf, ((0, MP - M), (0, 0)))

    def pad2(a, rows, cols):
        return jnp.pad(a, ((0, rows - a.shape[0]), (0, cols - a.shape[1])))

    # Zero-pad feature dims; pre-cast matmul operands to bf16 (f32 accumulate).
    w1lv_p = pad2(w1lv, D, HP).astype(jnp.bfloat16)
    w2lv_p = pad2(w2lv, HP, LP).astype(jnp.bfloat16)
    w1mu_p = pad2(w1mu, D, LP).astype(jnp.bfloat16)
    b1lv_p = pad2(b1lv, 1, HP)
    b2lv_p = pad2(b2lv, 1, LP)
    b1mu_p = pad2(b1mu, 1, LP)

    def const(shape):
        return pl.BlockSpec(shape, lambda i: (0, 0))

    kernel = functools.partial(_encoder_kernel, tile_m=tm, m_valid=M, latent=L)

    mu_raw, logvar_p, sum_part, sq_part = pl.pallas_call(
        kernel,
        grid=(grid_m,),
        in_specs=[pl.BlockSpec((tm, D), lambda i: (i, 0)),
                  const((D, HP)), const((1, HP)),
                  const((HP, LP)), const((1, LP)),
                  const((D, LP)), const((1, LP))],
        out_specs=(pl.BlockSpec((tm, L), lambda i: (i, 0)),   # raw mu (narrow)
                   pl.BlockSpec((tm, L), lambda i: (i, 0)),   # logvar (narrow)
                   pl.BlockSpec((8, LP), lambda i: (i, 0)),   # per-tile BN sum
                   pl.BlockSpec((8, LP), lambda i: (i, 0))),  # per-tile BN sumsq
        out_shape=(jax.ShapeDtypeStruct((MP, L), jnp.float32),
                   jax.ShapeDtypeStruct((MP, L), jnp.float32),
                   jax.ShapeDtypeStruct((grid_m * 8, LP), jnp.float32),
                   jax.ShapeDtypeStruct((grid_m * 8, LP), jnp.float32)),
        compiler_params=pltpu.CompilerParams(
            # No cross-iteration dependency -> megacore-parallel on v7x.
            dimension_semantics=("parallel",),
            # <= 48 MiB keeps us safe under v7x's 64 MiB physical VMEM while
            # giving v5e/v6e plenty of headroom for the big row tile.
            vmem_limit_bytes=48 * 1024 * 1024),
    )(xf, w1lv_p, b1lv_p, w2lv_p, b2lv_p, w1mu_p, b1mu_p)

    # Tiny JAX finalize: reduce BN partials, compute scale/shift, and apply
    # normalize + affine + clamp fused with the slice/reshape (no extra Pallas
    # pass, no mu round trip through HBM beyond the downstream read XLA needs
    # anyway).
    mu_sum = jnp.sum(sum_part, axis=0)[:L]
    mu_sq = jnp.sum(sq_part, axis=0)[:L]
    mean = mu_sum / M
    var = jnp.maximum(mu_sq / M - mean * mean, 0.0)
    inv_std = jax.lax.rsqrt(var + eps)
    scale = gamma[0] * inv_std
    shift = beta[0] - mean * scale

    mu = jnp.clip(mu_raw[:M] * scale + shift, -10.0, 10.0).reshape(B, S, L)
    logvar = logvar_p[:M].reshape(B, S, L)
    return mu, logvar


def init_params(key, input_dim, hidden_dim, latent_dim):
    """Deterministic synthetic parameters.

    Linear weights stored pre-transposed as (in, out) so the kernel computes
    x @ W + b (equivalent to PyTorch's x @ weight.T + bias). Biases / BN
    affine params kept 2D (1, N) for TPU-friendly layouts.
    """
    k1, k2, k3, k4, k5, k6 = jax.random.split(key, 6)

    def lin(kw, kb, fan_in, fan_out):
        bound = 1.0 / (fan_in ** 0.5)
        w = jax.random.uniform(kw, (fan_in, fan_out), jnp.float32, -bound, bound)
        b = jax.random.uniform(kb, (1, fan_out), jnp.float32, -bound, bound)
        return w, b

    w1lv, b1lv = lin(k1, k2, input_dim, hidden_dim)   # fc1_logvar
    w2lv, b2lv = lin(k3, k4, hidden_dim, latent_dim)  # fc2_logvar
    w1mu, b1mu = lin(k5, k6, input_dim, latent_dim)   # fc1_mu
    gamma = jnp.ones((1, latent_dim), jnp.float32)    # bn_mu.weight (default)
    beta = jnp.zeros((1, latent_dim), jnp.float32)    # bn_mu.bias   (default)
    return (w1lv, b1lv, w2lv, b2lv, w1mu, b1mu, gamma, beta)


def _reference_forward(x, params, eps=1e-5):
    """Pure-JAX reference mirroring the kernel's numerics (bf16 MXU operands)."""
    w1lv, b1lv, w2lv, b2lv, w1mu, b1mu, gamma, beta = params
    B, S, D = x.shape
    L = w1mu.shape[1]
    xf = x.reshape(B * S, D)
    sp = jnp.maximum(xf, 0.0) + jnp.log1p(jnp.exp(-jnp.abs(xf)))
    xl = jnp.log(sp)
    xl_bf = xl.astype(jnp.bfloat16)
    h = jnp.maximum(jnp.dot(xl_bf, w1lv.astype(jnp.bfloat16),
                            preferred_element_type=jnp.float32) + b1lv, 0.0)
    logvar = jnp.dot(h.astype(jnp.bfloat16), w2lv.astype(jnp.bfloat16),
                     preferred_element_type=jnp.float32) + b2lv
    mu = jnp.dot(xl_bf, w1mu.astype(jnp.bfloat16),
                 preferred_element_type=jnp.float32) + b1mu
    mean = jnp.mean(mu, axis=0, keepdims=True)
    var = jnp.maximum(jnp.mean(mu * mu, axis=0, keepdims=True) - mean * mean, 0.0)
    inv_std = jax.lax.rsqrt(var + eps)
    mu = jnp.clip((mu - mean) * inv_std * gamma + beta, -10.0, 10.0)
    return mu.reshape(B, S, L), logvar.reshape(B, S, L)


if __name__ == "__main__":
    B, S = 2, 8
    input_dim, hidden_dim, latent_dim = 32, 64, 16

    key = jax.random.PRNGKey(0)
    kx, kp = jax.random.split(key)
    x = jax.random.normal(kx, (B, S, input_dim), jnp.float32)
    params = init_params(kp, input_dim, hidden_dim, latent_dim)

    mu, logvar = jax.jit(encoder_forward)(x, params)
    jax.block_until_ready((mu, logvar))

    mu_ref, logvar_ref = _reference_forward(x, params)

    assert mu.shape == (B, S, latent_dim)
    assert logvar.shape == (B, S, latent_dim)
    assert bool(jnp.all(jnp.isfinite(mu))) and bool(jnp.all(jnp.isfinite(logvar)))
    assert bool(jnp.all(mu <= 10.0)) and bool(jnp.all(mu >= -10.0))
    assert bool(jnp.allclose(mu, mu_ref, atol=1e-2, rtol=1e-2))
    assert bool(jnp.allclose(logvar, logvar_ref, atol=1e-2, rtol=1e-2))
    print("KERNEL_OK")
</pallas_src>

<mosaic_0001>
module attributes {stable_mosaic.version = 11 : i64} {
  func.func @_encoder_kernel(%arg0: i32, %arg1: memref<16x32xf32, #tpu.memory_space<vmem>>, %arg2: memref<32x128xbf16, #tpu.memory_space<vmem>>, %arg3: memref<1x128xf32, #tpu.memory_space<vmem>>, %arg4: memref<128x128xbf16, #tpu.memory_space<vmem>>, %arg5: memref<1x128xf32, #tpu.memory_space<vmem>>, %arg6: memref<32x128xbf16, #tpu.memory_space<vmem>>, %arg7: memref<1x128xf32, #tpu.memory_space<vmem>>, %arg8: memref<16x16xf32, #tpu.memory_space<vmem>>, %arg9: memref<16x16xf32, #tpu.memory_space<vmem>>, %arg10: memref<8x128xf32, #tpu.memory_space<vmem>>, %arg11: memref<8x128xf32, #tpu.memory_space<vmem>>) attributes {dimension_semantics = [#tpu.dimension_semantics<parallel>], iteration_bounds = array<i64: 1>, scalar_prefetch = 0 : i64, scratch_operands = 0 : i64, tpu.core_type = #tpu.core_type<tc>, window_params = [{transform_indices = @transform_0, window_bounds = array<i64: 16, 32>}, {pipeline_mode = #tpu.pipeline_mode<synchronous>, transform_indices = @transform_1, window_bounds = array<i64: 32, 128>}, {pipeline_mode = #tpu.pipeline_mode<synchronous>, transform_indices = @transform_2, window_bounds = array<i64: 1, 128>}, {pipeline_mode = #tpu.pipeline_mode<synchronous>, transform_indices = @transform_3, window_bounds = array<i64: 128, 128>}, {pipeline_mode = #tpu.pipeline_mode<synchronous>, transform_indices = @transform_4, window_bounds = array<i64: 1, 128>}, {pipeline_mode = #tpu.pipeline_mode<synchronous>, transform_indices = @transform_5, window_bounds = array<i64: 32, 128>}, {pipeline_mode = #tpu.pipeline_mode<synchronous>, transform_indices = @transform_6, window_bounds = array<i64: 1, 128>}, {transform_indices = @transform_7, window_bounds = array<i64: 16, 16>}, {transform_indices = @transform_8, window_bounds = array<i64: 16, 16>}, {transform_indices = @transform_9, window_bounds = array<i64: 8, 128>}, {transform_indices = @transform_10, window_bounds = array<i64: 8, 128>}]} {
    %c0 = arith.constant 0 : index
    %c0_0 = arith.constant 0 : index
    %0 = vector.load %arg1[%c0, %c0_0] : memref<16x32xf32, #tpu.memory_space<vmem>>, vector<16x32xf32>
    %cst = arith.constant 0.000000e+00 : f32
    %1 = vector.broadcast %cst : f32 to vector<16x32xf32>
    %2 = arith.maximumf %0, %1 : vector<16x32xf32>
    %3 = math.absf %0 : vector<16x32xf32>
    %cst_1 = arith.constant 0.000000e+00 : f32
    %4 = vector.broadcast %cst_1 : f32 to vector<16x32xf32>
    %5 = arith.subf %4, %3 : vector<16x32xf32>
    %6 = math.exp %5 : vector<16x32xf32>
    %7 = math.log1p %6 : vector<16x32xf32>
    %8 = arith.addf %2, %7 : vector<16x32xf32>
    %9 = math.log %8 : vector<16x32xf32>
    %10 = arith.truncf %9 : vector<16x32xf32> to vector<16x32xbf16>
    %c0_2 = arith.constant 0 : index
    %c0_3 = arith.constant 0 : index
    %11 = vector.load %arg2[%c0_2, %c0_3] : memref<32x128xbf16, #tpu.memory_space<vmem>>, vector<32x128xbf16>
    %cst_4 = arith.constant dense<0.000000e+00> : vector<16x128xf32>
    %12 = tpu.matmul %10, %11, %cst_4 {dimension_numbers = #tpu.dot_dimension_numbers<[1], [0], [0], [1], [0, 0, 1, 1], [], []>} : vector<16x32xbf16>, vector<32x128xbf16>, vector<16x128xf32> -> vector<16x128xf32>
    %c0_5 = arith.constant 0 : index
    %c0_6 = arith.constant 0 : index
    %13 = vector.load %arg3[%c0_5, %c0_6] : memref<1x128xf32, #tpu.memory_space<vmem>>, vector<1x128xf32>
    %14 = vector.broadcast %13 : vector<1x128xf32> to vector<16x128xf32>
    %15 = arith.addf %12, %14 : vector<16x128xf32>
    %cst_7 = arith.constant 0.000000e+00 : f32
    %16 = vector.broadcast %cst_7 : f32 to vector<16x128xf32>
    %17 = arith.maximumf %15, %16 : vector<16x128xf32>
    %18 = arith.truncf %17 : vector<16x128xf32> to vector<16x128xbf16>
    %c0_8 = arith.constant 0 : index
    %c0_9 = arith.constant 0 : index
    %19 = vector.load %arg4[%c0_8, %c0_9] : memref<128x128xbf16, #tpu.memory_space<vmem>>, vector<128x128xbf16>
    %cst_10 = arith.constant dense<0.000000e+00> : vector<16x128xf32>
    %20 = tpu.matmul %18, %19, %cst_10 {dimension_numbers = #tpu.dot_dimension_numbers<[1], [0], [0], [1], [0, 0, 1, 1], [], []>} : vector<16x128xbf16>, vector<128x128xbf16>, vector<16x128xf32> -> vector<16x128xf32>
    %c0_11 = arith.constant 0 : index
    %c0_12 = arith.constant 0 : index
    %21 = vector.load %arg5[%c0_11, %c0_12] : memref<1x128xf32, #tpu.memory_space<vmem>>, vector<1x128xf32>
    %22 = vector.broadcast %21 : vector<1x128xf32> to vector<16x128xf32>
    %23 = arith.addf %20, %22 : vector<16x128xf32>
    %c0_13 = arith.constant 0 : index
    %c0_14 = arith.constant 0 : index
    %24 = vector.load %arg6[%c0_13, %c0_14] : memref<32x128xbf16, #tpu.memory_space<vmem>>, vector<32x128xbf16>
    %cst_15 = arith.constant dense<0.000000e+00> : vector<16x128xf32>
    %25 = tpu.matmul %10, %24, %cst_15 {dimension_numbers = #tpu.dot_dimension_numbers<[1], [0], [0], [1], [0, 0, 1, 1], [], []>} : vector<16x32xbf16>, vector<32x128xbf16>, vector<16x128xf32> -> vector<16x128xf32>
    %c0_16 = arith.constant 0 : index
    %c0_17 = arith.constant 0 : index
    %26 = vector.load %arg7[%c0_16, %c0_17] : memref<1x128xf32, #tpu.memory_space<vmem>>, vector<1x128xf32>
    %27 = vector.broadcast %26 : vector<1x128xf32> to vector<16x128xf32>
    %28 = arith.addf %25, %27 : vector<16x128xf32>
    %29 = vector.extract_strided_slice %28 {offsets = [0, 0], sizes = [16, 16], strides = [1, 1]} : vector<16x128xf32> to vector<16x16xf32>
    %c0_18 = arith.constant 0 : index
    %c0_19 = arith.constant 0 : index
    %30 = vector.load %arg8[%c0_18, %c0_19] : memref<16x16xf32, #tpu.memory_space<vmem>>, vector<16x16xf32>
    tpu.vector_store %arg8[%c0_18, %c0_19], %29 {strides = array<i32>} : memref<16x16xf32, #tpu.memory_space<vmem>>, vector<16x16xf32>,
    %31 = vector.extract_strided_slice %23 {offsets = [0, 0], sizes = [16, 16], strides = [1, 1]} : vector<16x128xf32> to vector<16x16xf32>
    %c0_20 = arith.constant 0 : index
    %c0_21 = arith.constant 0 : index
    %32 = vector.load %arg9[%c0_20, %c0_21] : memref<16x16xf32, #tpu.memory_space<vmem>>, vector<16x16xf32>
    tpu.vector_store %arg9[%c0_20, %c0_21], %31 {strides = array<i32>} : memref<16x16xf32, #tpu.memory_space<vmem>>, vector<16x16xf32>,
    %c16_i32 = arith.constant 16 : i32
    %33 = arith.muli %arg0, %c16_i32 : i32
    %34 = tpu.iota {dimensions = array<i32: 0>} : vector<16x1xi32>
    %35 = vector.broadcast %33 : i32 to vector<16x1xi32>
    %36 = arith.addi %35, %34 : vector<16x1xi32>
    %c16_i32_22 = arith.constant 16 : i32
    %37 = vector.broadcast %c16_i32_22 : i32 to vector<16x1xi32>
    %38 = arith.cmpi slt, %36, %37 : vector<16x1xi32>
    %39 = arith.extui %38 : vector<16x1xi1> to vector<16x1xi32>
    %40 = arith.sitofp %39 : vector<16x1xi32> to vector<16x1xf32>
    %41 = vector.broadcast %40 : vector<16x1xf32> to vector<16x128xf32>
    %42 = arith.mulf %28, %41 : vector<16x128xf32>
    %43 = vector.shape_cast %42 : vector<16x128xf32> to vector<2x8x128xf32>
    %cst_23 = arith.constant dense<0.000000e+00> : vector<8x128xf32>
    %44 = vector.multi_reduction <add>, %43, %cst_23 [0] : vector<2x8x128xf32> to vector<8x128xf32>
    %c0_24 = arith.constant 0 : index
    %c0_25 = arith.constant 0 : index
    %45 = vector.load %arg10[%c0_24, %c0_25] : memref<8x128xf32, #tpu.memory_space<vmem>>, vector<8x128xf32>
    tpu.vector_store %arg10[%c0_24, %c0_25], %44 {strides = array<i32>} : memref<8x128xf32, #tpu.memory_space<vmem>>, vector<8x128xf32>,
    %46 = arith.mulf %42, %28 : vector<16x128xf32>
    %47 = vector.shape_cast %46 : vector<16x128xf32> to vector<2x8x128xf32>
    %cst_26 = arith.constant dense<0.000000e+00> : vector<8x128xf32>
    %48 = vector.multi_reduction <add>, %47, %cst_26 [0] : vector<2x8x128xf32> to vector<8x128xf32>
    %c0_27 = arith.constant 0 : index
    %c0_28 = arith.constant 0 : index
    %49 = vector.load %arg11[%c0_27, %c0_28] : memref<8x128xf32, #tpu.memory_space<vmem>>, vector<8x128xf32>
    tpu.vector_store %arg11[%c0_27, %c0_28], %48 {strides = array<i32>} : memref<8x128xf32, #tpu.memory_space<vmem>>, vector<8x128xf32>,
    return
  }
  func.func @transform_0(%arg0: i32) -> (i32, i32) {
    %c0_i32 = arith.constant 0 : i32
    %c0_i32_0 = arith.constant 0 : i32
    return %arg0, %c0_i32 : i32, i32
  }
  func.func @transform_1(%arg0: i32) -> (i32, i32) {
    %c0_i32 = arith.constant 0 : i32
    %c0_i32_0 = arith.constant 0 : i32
    %c0_i32_1 = arith.constant 0 : i32
    return %c0_i32, %c0_i32_0 : i32, i32
  }
  func.func @transform_2(%arg0: i32) -> (i32, i32) {
    %c0_i32 = arith.constant 0 : i32
    %c0_i32_0 = arith.constant 0 : i32
    %c0_i32_1 = arith.constant 0 : i32
    return %c0_i32, %c0_i32_0 : i32, i32
  }
  func.func @transform_3(%arg0: i32) -> (i32, i32) {
    %c0_i32 = arith.constant 0 : i32
    %c0_i32_0 = arith.constant 0 : i32
    %c0_i32_1 = arith.constant 0 : i32
    return %c0_i32, %c0_i32_0 : i32, i32
  }
  func.func @transform_4(%arg0: i32) -> (i32, i32) {
    %c0_i32 = arith.constant 0 : i32
    %c0_i32_0 = arith.constant 0 : i32
    %c0_i32_1 = arith.constant 0 : i32
    return %c0_i32, %c0_i32_0 : i32, i32
  }
  func.func @transform_5(%arg0: i32) -> (i32, i32) {
    %c0_i32 = arith.constant 0 : i32
    %c0_i32_0 = arith.constant 0 : i32
    %c0_i32_1 = arith.constant 0 : i32
    return %c0_i32, %c0_i32_0 : i32, i32
  }
  func.func @transform_6(%arg0: i32) -> (i32, i32) {
    %c0_i32 = arith.constant 0 : i32
    %c0_i32_0 = arith.constant 0 : i32
    %c0_i32_1 = arith.constant 0 : i32
    return %c0_i32, %c0_i32_0 : i32, i32
  }
  func.func @transform_7(%arg0: i32) -> (i32, i32) {
    %c0_i32 = arith.constant 0 : i32
    %c0_i32_0 = arith.constant 0 : i32
    return %arg0, %c0_i32 : i32, i32
  }
  func.func @transform_8(%arg0: i32) -> (i32, i32) {
    %c0_i32 = arith.constant 0 : i32
    %c0_i32_0 = arith.constant 0 : i32
    return %arg0, %c0_i32 : i32, i32
  }
  func.func @transform_9(%arg0: i32) -> (i32, i32) {
    %c0_i32 = arith.constant 0 : i32
    %c0_i32_0 = arith.constant 0 : i32
    return %arg0, %c0_i32 : i32, i32
  }
  func.func @transform_10(%arg0: i32) -> (i32, i32) {
    %c0_i32 = arith.constant 0 : i32
    %c0_i32_0 = arith.constant 0 : i32
    return %arg0, %c0_i32 : i32, i32
  }
}

</mosaic_0001>

<bundles_post_ra>
// kernel: encoder_forward.1
= control target key start
LH: loop header
LB: loop body
LE: loop exit
PB: predicated region body
PF: predicated region fallthrough
CT: control target
= control target key end

     0   :  { %v491_v1 = vmov 0.0   ;;  %vm492_vm0 = vmmov 0   ;;  %s648_s0 = inlined_call_operand.vmem [shape: f32[16,32], index: 0, kind: input, shape index: {}]   ;;  %s649_s1 = inlined_call_operand.vmem [shape: bf16[32,128], index: 1, kind: input, shape index: {}]   ;;  %s650_s2 = inlined_call_operand.vmem [shape: f32[1,128], index: 2, kind: input, shape index: {}]   ;;  %s651_s3 = inlined_call_operand.vmem [shape: bf16[128,128], index: 3, kind: input, shape index: {}]   ;;  %s652_s4 = inlined_call_operand.vmem [shape: f32[1,128], index: 4, kind: input, shape index: {}]   ;;  %s653_s5 = inlined_call_operand.vmem [shape: bf16[32,128], index: 5, kind: input, shape index: {}]   ;;  %s654_s6 = inlined_call_operand.vmem [shape: f32[1,128], index: 6, kind: input, shape index: {}]   ;;  %s655_s7 = inlined_call_operand.vmem [shape: f32[16,16], index: 7, kind: output, shape index: {0}]   ;;  %s656_s8 = inlined_call_operand.hbm [shape: f32[16,16], index: 8, kind: output, shape index: {1}]   ;;  %s657_s9 = inlined_call_operand.vmem [shape: f32[8,128], index: 9, kind: output, shape index: {2}]   ;;  %s658_s10 = inlined_call_operand.vmem [shape: f32[8,128], index: 10, kind: output, shape index: {3}]  }
   0x1   :  { %v443_v0 = vld [vmem:[%s649_s1] sm:$0xff]   ;;  %402 = vmatprep.subr.bf16.mxu0 %v491_v1  ;;  %v444_v2 = vld [vmem:[%s649_s1 + $0x8] sm:$0xff]   ;;  %410 = vmatprep.subr.bf16.mxu1 %v491_v1  ;;  %v447_v13 = vld [vmem:[%s651_s3 + $0x10] sm:$0xff]  }
   0x2   :  { %403 = vmatpush3.bf16.msra.mxu0 %v443_v0  ;;  %406 = vmatprep.mubr.msk.bf16.mxu0 %vm492_vm0, %v491_v1  ;;  %v32_v3 = vld [vmem:[%s648_s0] sm:$0xff]  ;;  %v33_v4 = vld [vmem:[%s648_s0 + $0x8] sm:$0xff] }
   0x3   :  { %404 = vmatprep.subr.bf16.mxu0 %v491_v1  ;;  %v36_v5 = vand.u32 2147483647, %v32_v3  ;;  %v37_v6 = vand.u32 2147483647, %v33_v4  ;;  %426 = vmatprep.mubr.msk.bf16.mxu1 %vm492_vm0, %v491_v1  ;;  %v445_v7 = vld [vmem:[%s651_s3] sm:$0xff]   ;;  %v446_v10 = vld [vmem:[%s651_s3 + $0x8] sm:$0xff]  }
   0x4   :  { %411 = vmatpush3.bf16.msra.mxu1 %v445_v7 }
   0x5   :  { %v38_v8 = vsub.f32 0.0, %v36_v5  ;;  %v39_v9 = vsub.f32 0.0, %v37_v6  ;;  %412 = vmatprep.subr.bf16.mxu1 %v491_v1 }
   0x6   :  { %405 = vmatpush3.bf16.msra.mxu0 %v444_v2 }
   0x7   :  { %v40_v11 = vmul.f32 1.442695, %v38_v8  ;;  %v42_v12 = vmul.f32 1.442695, %v39_v9  ;;  %430 = vmatprep.subr.bf16.mxu0 %v491_v1 }
   0x8   :  { %413 = vmatpush3.bf16.msra.mxu1 %v446_v10 }
   0x9   :  { %455 = vpow2.f32 %v40_v11  ;;  %414 = vmatprep.subr.bf16.mxu1 %v491_v1 }
   0xa   :  { %457 = vpow2.f32 %v42_v12 }
   0xb   :  { %16 = vsyncpa [#allocation3], 0  ;;  %v448_v14 = vld [vmem:[%s651_s3 + $0x18] sm:$0xff]   ;;  %v449_v15 = vld [vmem:[%s651_s3 + $0x20] sm:$0xff]   ;;  %v34_v29 = vmax.f32 %v32_v3, 0.0  ;;  %v35_v32 = vmax.f32 %v33_v4, 0.0 }
   0xc   :  { %415 = vmatpush3.bf16.msra.mxu1 %v447_v13  ;;  %v451_v20 = vld [vmem:[%s651_s3 + $0x28] sm:$0xff]   ;;  %vm92_vm3 = vcmask 261120   ;;  %v450_v43 = vld [vmem:[%s653_s5] sm:$0xff]   ;;  %v453_v46 = vld [vmem:[%s651_s3 + $0x30] sm:$0xff]   ;;  %vm316_vm4 = vcmask 130048   ;;  %s493_s27 = smov [#allocation2]  }
   0xd   :  { %416 = vmatprep.subr.bf16.mxu1 %v491_v1  ;;  %v452_v45 = vld [vmem:[%s653_s5 + $0x8] sm:$0xff]   ;;  %v454_v47 = vld [vmem:[%s651_s3 + $0x38] sm:$0xff]   ;;  %v370_v48 = vld [vmem:[%s650_s2] ss:$0 sm:$0xff]  ;;  %s349_s28 = sshll.u32 %s493_s27, 4  ;;  %s350_s28 = int_to_ptr.vmem [resolvable:$true] %s349_s28 }
   0xe   :  { %v383_v58 = vld [vmem:[%s654_s6] ss:$0 sm:$0xff]  ;;  %p472_p1 = scmp.lt.s32.totalorder %s350_s28, %s350_s28 }
   0xf   :  { %v374_v5 = vld [vmem:[%s652_s4] ss:$0 sm:$0xff] }
  0x10   :  { %417 = vmatpush3.bf16.msra.mxu1 %v448_v14 }
  0x11   :  { %418 = vmatprep.subr.bf16.mxu1 %v491_v1 }
  0x13   :  { %v456_v16 = vpop.eup %455 }
  0x14   :  { %v458_v17 = vpop.eup %457  ;;  %v44_v18 = vadd.f32 1.0, %v456_v16  ;;  %419 = vmatpush3.bf16.msra.mxu1 %v449_v15  ;;  %v47_v21 = vmul.f32 -0.5, %v456_v16  ;;  %v50_v24 = vand.u32 2147483647, %v456_v16 }
  0x15   :  { %v53_v19 = vadd.f32 1.0, %v458_v17  ;;  %420 = vmatprep.subr.bf16.mxu1 %v491_v1  ;;  %v56_v22 = vmul.f32 -0.5, %v458_v17  ;;  %v59_v26 = vand.u32 2147483647, %v458_v17 }
  0x16   :  { %459 = vlog2.f32 %v44_v18  ;;  %v48_v23 = vadd.f32 1.0, %v47_v21  ;;  %vm51_vm1 = vcmp.lt.f32.partialorder %v50_v24, 0.0004427343 }
  0x17   :  { %461 = vlog2.f32 %v53_v19  ;;  %v57_v25 = vadd.f32 1.0, %v56_v22  ;;  %vm60_vm2 = vcmp.lt.f32.partialorder %v59_v26, 0.0004427343 }
  0x18   :  { %421 = vmatpush3.bf16.msra.mxu1 %v451_v20  ;;  %v49_v27 = vmul.f32 %v456_v16, %v48_v23 }
  0x19   :  { %422 = vmatprep.subr.bf16.mxu1 %v491_v1  ;;  %v58_v30 = vmul.f32 %v458_v17, %v57_v25 }
  0x1c   :  { %423 = vmatpush3.bf16.msra.mxu1 %v453_v46 }
  0x1d   :  { %424 = vmatprep.subr.bf16.mxu1 %v491_v1 }
  0x20   :  { %v460_v28 = vpop.eup %459  ;;  %425 = vmatpush3.bf16.msra.mxu1 %v454_v47 }
  0x21   :  { %v462_v31 = vpop.eup %461  ;;  %v46_v33 = vmul.f32 0.6931472, %v460_v28 }
  0x22   :  { %v55_v34 = vmul.f32 0.6931472, %v462_v31 }
  0x23   :  { %v52_v35 = vsel %vm51_vm1, %v49_v27, %v46_v33 }
  0x24   :  { %v61_v36 = vsel %vm60_vm2, %v58_v30, %v55_v34  ;;  %v62_v37 = vadd.f32 %v52_v35, %v34_v29 }
  0x25   :  { %v63_v38 = vadd.f32 %v61_v36, %v35_v32 }
  0x26   :  { %463 = vlog2.f32 %v62_v37 }
  0x27   :  { %465 = vlog2.f32 %v63_v38 }
  0x30   :  { %v464_v39 = vpop.eup %463 }
  0x31   :  { %v466_v40 = vpop.eup %465  ;;  %v65_v41 = vmul.f32 0.6931472, %v464_v39 }
  0x32   :  { %v67_v42 = vmul.f32 0.6931472, %v466_v40 }
  0x34   :  { %v68_v44 = vpack.c.bf16 %v67_v42, %v65_v41 }
  0x36   :  { %407 = vmatmul.mubr.msk.bf16.vlgmr.msra.gmra.mrb[0].mxu0 %vm92_vm3, %v68_v44 }
  0x37   :  { %431 = vmatpush3.bf16.msra.mxu0 %v450_v43  ;;  %434 = vmatprep.mubr.msk.bf16.mxu0 %vm492_vm0, %v491_v1 }
  0x38   :  { %432 = vmatprep.subr.bf16.mxu0 %v491_v1 }
  0x3b   :  { %433 = vmatpush3.bf16.msra.mxu0 %v452_v45 }
  0x3e   :  { %435 = vmatmul.mubr.msk.bf16.vlgmr.msra.gmra.mrb[4].mxu0 %vm92_vm3, %v68_v44 }
 0x109   :  { %v130_v49 = vpop.f32.mrb[0].mxu0 }
 0x10a   :  { %v131_v50 = vadd.f32 %v370_v48, %v130_v49  ;;  %v408_v51 = vpop.f32.mrb[1].mxu0 }
 0x10b   :  { %v133_v52 = vpop.f32.mrb[2].mxu0 }
 0x10c   :  { %v134_v53 = vadd.f32 %v370_v48, %v133_v52  ;;  %v409_v54 = vpop.f32.mrb[3].mxu0  ;;  %v137_v55 = vmax.f32 %v131_v50, 0.0 }
 0x10e   :  { %v138_v56 = vmax.f32 %v134_v53, 0.0 }
 0x110   :  { %v139_v57 = vpack.c.bf16 %v138_v56, %v137_v55 }
 0x111   :  { %v309_v59 = vpop.f32.mrb[4].mxu0 }
 0x112   :  { %427 = vmatmul.mubr.bf16.vlgmr.msra.gmra.mrb[0].mxu1 %v139_v57  ;;  %v310_v60 = vadd.f32 %v383_v58, %v309_v59  ;;  %v436_v61 = vpop.f32.mrb[5].mxu0 }
 0x113   :  { %v312_v62 = vpop.f32.mrb[6].mxu0 }
 0x114   :  { %317 = vst.msk [vmem:[%s655_s7] sm:$0xff] %vm316_vm4, %v310_v60  ;;  %v338_v63 = vmul.f32 %v310_v60, %v310_v60  ;;  %v313_v0 = vadd.f32 %v383_v58, %v312_v62  ;;  %v437_v1 = vpop.f32.mrb[7].mxu0 }
 0x116   :  { %318 = vst.msk [vmem:[%s655_s7 + $0x8] sm:$0xff] %vm316_vm4, %v313_v0  ;;  %v336_v2 = vadd.f32 %v313_v0, %v310_v60  ;;  %v339_v3 = vmul.f32 %v313_v0, %v313_v0  ;;  %s467_s7 = scalar_lea.vmem %s350_s28, 256 }
 0x117   :  { %p468_p0 = scmp.ne.s32.totalorder %s350_s28, %s467_s7  ;;  %p473_p2 = scmp.lt.s32.totalorder %s467_s7, %s467_s7 }
 0x118   :  { %337 = vst [vmem:[%s657_s9] sm:$0xff] %v336_v2  ;;  %v340_v4 = vadd.f32 %v339_v3, %v338_v63 }
 0x119   :  { %p474_p3 = por %p473_p2, %p472_p1 }
 0x11a   :  { %341 = vst [vmem:[%s658_s10] sm:$0xff] %v340_v4 }
 0x11b   :  { %p475_p4 = pnand %p474_p3, %p468_p0 }
 0x1e5   :  { %v245_v6 = vpop.f32.mrb[0].mxu1 }
 0x1e6   :  { %v246_v7 = vadd.f32 %v374_v5, %v245_v6  ;;  %v428_v8 = vpop.f32.mrb[1].mxu1 }
 0x1e7   :  { %v248_v9 = vpop.f32.mrb[2].mxu1 }
 0x1e8   :  { %319 = vst.msk [vmem:[#allocation2] sm:$0xff] %vm316_vm4, %v246_v7  ;;  %v249_v10 = vadd.f32 %v374_v5, %v248_v9  ;;  %v429_v11 = vpop.f32.mrb[3].mxu1 }
 0x1ea   :  { %320 = vst.msk [vmem:[#allocation2 + $0x8] sm:$0xff] %vm316_vm4, %v249_v10 }
 0x1eb   :  { %478 = shalt.err (!%p475_p4)
}
 0x1ec   :  { %s479_s10 = scalar_lea.hbm %s656_s8, 256 }
 0x1ed   :  { %p480_p5 = scmp.ne.s32.totalorder %s656_s8, %s479_s10  ;;  %p483_p6 = scmp.lt.u32.totalorder %s479_s10, %s656_s8 }
 0x1ef   :  { %p485_p7 = pnand %p483_p6, %p480_p5 }
 0x1f1   :  { %488 = shalt.err (!%p485_p7)
}
 0x1f2   :  { %s494_s13 = smov 128   ;;  %s495_s14 = smov 8  }
 0x1f3   :  { %355 = dma.vmem_to_hbm [thread:$0]  %s350_s28, 256, %s656_s8, [#allocation3], %s494_s13, %s494_s13, %s495_s14  }
 0x1f4   :  { %489 = dma.done.wait [#allocation3], 256  }
 0x1f5   :  { %490 = vsyncadd [#allocation3], 4294967040 }
 0x1f6   :  { %369 = vsyncpa [#allocation3], 1 }

</bundles_post_ra>
